<compile_context>
chip_gen: v7x
topology: tpu7x:2x2x1
jax: 0.10.0
libtpu: 0.0.40
codegen_flags: <defaults>
</compile_context>

<pallas_src>
import jax
import jax.numpy as jnp
from jax.experimental import pallas as pl
from jax.experimental.pallas import tpu as pltpu

# ---- problem sizes (small, consistent with the module) ----
B = 8                  # batch for the demo
OBS_DIMS = 30
SKILL_DIMS = 2
N_ACTIONS = 2
FEATURES_DIM = 64      # hidden width per network
ACTOR_LAYERS = 6
CRITIC_LAYERS = 6
assert ACTOR_LAYERS == CRITIC_LAYERS, "fused block-diagonal packing assumes equal depth"
HIDDEN_LAYERS = ACTOR_LAYERS - 1
D_IN = OBS_DIMS + SKILL_DIMS          # 32 = concat(obs, skill)
IN_LANES = 64                         # packed input slab width [obs|skill|action|pad]
FUSED = 2 * FEATURES_DIM              # 128-wide fused hidden state (actor | critic)
OUT_LANES = 8                         # packed output slab width
BATCH_TILE = 8                        # demo batch tile (use 128/256 for large B)

_LOG_2PI = float(jnp.log(2.0 * jnp.pi))


# ----------------------------------------------------------------------------
# Kernel
# ----------------------------------------------------------------------------
def _actor_critic_kernel(x_ref, w0_ref, wh_ref, whead_ref, b_ref, out_ref):
    # x: (TB, 64) f32 = [obs 0:30 | skill 30:32 | action 32:34 | zeros]
    x = x_ref[...]
    a = x[:, D_IN:D_IN + N_ACTIONS]                    # (TB, 2) action, f32

    # ---- fused first layer: one matmul (action / pad rows of W0 are zero) ----
    h = jnp.dot(x.astype(jnp.bfloat16), w0_ref[...],
                preferred_element_type=jnp.float32)
    h = jnp.maximum(h + b_ref[0], 0.0)                 # (TB, 128)

    # ---- fused hidden layers (block-diagonal actor/critic weights) ----
    for i in range(HIDDEN_LAYERS):
        h = jnp.maximum(
            jnp.dot(h.astype(jnp.bfloat16), wh_ref[i],
                    preferred_element_type=jnp.float32) + b_ref[i + 1],
            0.0)

    # ---- fused heads: cols 0:2 mu, 2:4 sigma, 4 value (rest zero-padded) ----
    head = (jnp.dot(h.astype(jnp.bfloat16), whead_ref[...],
                    preferred_element_type=jnp.float32)
            + b_ref[HIDDEN_LAYERS + 1])                # (TB, 128)
    mu = head[:, 0:N_ACTIONS]
    sigma = jnp.clip(head[:, N_ACTIONS:2 * N_ACTIONS], 1e-6, 1.0)
    value = head[:, 2 * N_ACTIONS:2 * N_ACTIONS + 1]   # (TB, 1)

    # ---- Normal(mu, sigma): log_prob / entropy, summed over 2 action lanes ----
    z = (a - mu) / sigma
    log_sigma = jnp.log(sigma)
    logp = -0.5 * z * z - log_sigma - 0.5 * _LOG_2PI   # (TB, 2)
    ent = 0.5 + 0.5 * _LOG_2PI + log_sigma             # (TB, 2)
    logp_sum = logp[:, 0:1] + logp[:, 1:2]             # explicit lane adds (VPU)
    ent_sum = ent[:, 0:1] + ent[:, 1:2]

    # ---- direct column stores (no concatenate / relayout) ----
    out_ref[:, 0:1] = logp_sum
    out_ref[:, 1:2] = value
    out_ref[:, 2:3] = ent_sum
    out_ref[:, 3:] = jnp.zeros((out_ref.shape[0], OUT_LANES - 3), jnp.float32)


# ----------------------------------------------------------------------------
# Parameter construction / packing
# ----------------------------------------------------------------------------
def make_params(key, d_in=D_IN, h=FEATURES_DIM, n_actions=N_ACTIONS,
                actor_layers=ACTOR_LAYERS, critic_layers=CRITIC_LAYERS):
    """Deterministic synthetic per-network parameters (fan-in scaled normals)."""
    ks = list(jax.random.split(key, 8))

    def lin(k, fin, fout):
        return jax.random.normal(k, (fin, fout), jnp.float32) / jnp.sqrt(float(fin))

    return dict(
        wa0=lin(ks[0], d_in, h),
        ba0=jnp.zeros((1, h), jnp.float32),
        wah=jax.random.normal(ks[1], (actor_layers - 1, h, h), jnp.float32) / jnp.sqrt(float(h)),
        bah=jnp.zeros((actor_layers - 1, h), jnp.float32),
        wmu=lin(ks[2], h, n_actions),
        bmu=jnp.zeros((1, n_actions), jnp.float32),
        # sigma head kept well away from the 1e-6 clip floor for a stable test
        wsg=0.05 * lin(ks[3], h, n_actions),
        bsg=0.7 * jnp.ones((1, n_actions), jnp.float32),
        wc0=lin(ks[4], d_in, h),
        bc0=jnp.zeros((1, h), jnp.float32),
        wch=jax.random.normal(ks[5], (critic_layers - 1, h, h), jnp.float32) / jnp.sqrt(float(h)),
        bch=jnp.zeros((critic_layers - 1, h), jnp.float32),
        wv=lin(ks[6], h, 1),
        bv=jnp.zeros((1, 1), jnp.float32),
    )


def pack_params(p, batch_tile=BATCH_TILE):
    """One-time host-side packing of per-network weights into the fused layout."""
    h = FEATURES_DIM
    L = HIDDEN_LAYERS

    # First layer: (64, 128); rows 0:32 = [Wa0 | Wc0], action/pad rows zero so the
    # packed (B, 64) input slab can be multiplied directly (no in-kernel concat).
    w0 = jnp.zeros((IN_LANES, FUSED), jnp.float32)
    w0 = w0.at[:D_IN, :h].set(p["wa0"])
    w0 = w0.at[:D_IN, h:].set(p["wc0"])

    # Hidden layers: block-diagonal [[Wa, 0], [0, Wc]]            (L, 128, 128)
    z = jnp.zeros((L, h, h), jnp.float32)
    wh = jnp.concatenate(
        [jnp.concatenate([p["wah"], z], axis=2),
         jnp.concatenate([z, p["wch"]], axis=2)], axis=1)

    # Heads packed into one lane-dense (128, 128) matrix (zero-padded columns).
    whead = jnp.zeros((FUSED, FUSED), jnp.float32)
    whead = whead.at[:h, 0:N_ACTIONS].set(p["wmu"])
    whead = whead.at[:h, N_ACTIONS:2 * N_ACTIONS].set(p["wsg"])
    whead = whead.at[h:, 2 * N_ACTIONS:2 * N_ACTIONS + 1].set(p["wv"])

    # Biases stacked and PRE-BROADCAST to the batch tile: (L+2, TB, 128) f32.
    b = jnp.zeros((L + 2, FUSED), jnp.float32)
    b = b.at[0, :h].set(p["ba0"][0])
    b = b.at[0, h:].set(p["bc0"][0])
    b = b.at[1:L + 1, :h].set(p["bah"])
    b = b.at[1:L + 1, h:].set(p["bch"])
    b = b.at[L + 1, 0:N_ACTIONS].set(p["bmu"][0])
    b = b.at[L + 1, N_ACTIONS:2 * N_ACTIONS].set(p["bsg"][0])
    b = b.at[L + 1, 2 * N_ACTIONS:2 * N_ACTIONS + 1].set(p["bv"][0])
    b_bcast = jnp.asarray(
        jnp.broadcast_to(b[:, None, :], (L + 2, batch_tile, FUSED)), jnp.float32)

    return dict(
        w0=w0.astype(jnp.bfloat16),        # bf16 matmul operands, f32 accumulate
        wh=wh.astype(jnp.bfloat16),
        whead=whead.astype(jnp.bfloat16),
        b=b_bcast,
    )


# ----------------------------------------------------------------------------
# Wrapper
# ----------------------------------------------------------------------------
@jax.jit
def actor_critic_evaluate(observation, skill, action, packed):
    """Pallas implementation of ActorCritic.evaluate(observation, skill, action).

    Returns (action_logprobs (B,1), state_values (B,1), dist_entropy (B,1)).
    """
    bsz = observation.shape[0]
    tb = packed["b"].shape[1]                       # batch tile (biases pre-broadcast)
    bp = ((bsz + tb - 1) // tb) * tb                # padded batch (static under jit)

    # Pack obs / skill / action into one lane-padded (bp, 64) f32 slab.
    x = jnp.zeros((bp, IN_LANES), jnp.float32)
    x = x.at[:bsz, 0:OBS_DIMS].set(observation.astype(jnp.float32))
    x = x.at[:bsz, OBS_DIMS:OBS_DIMS + SKILL_DIMS].set(skill.astype(jnp.float32))
    x = x.at[:bsz, D_IN:D_IN + N_ACTIONS].set(action.astype(jnp.float32))

    out = pl.pallas_call(
        _actor_critic_kernel,
        out_shape=jax.ShapeDtypeStruct((bp, OUT_LANES), jnp.float32),
        grid=(bp // tb,),
        in_specs=[
            # activation slab streams over the batch grid
            pl.BlockSpec((tb, IN_LANES), lambda i: (i, 0)),
            # weights / biases: same block every step -> DMA'd once, VMEM-resident
            pl.BlockSpec((IN_LANES, FUSED), lambda i: (0, 0)),
            pl.BlockSpec((HIDDEN_LAYERS, FUSED, FUSED), lambda i: (0, 0, 0)),
            pl.BlockSpec((FUSED, FUSED), lambda i: (0, 0)),
            pl.BlockSpec((HIDDEN_LAYERS + 2, tb, FUSED), lambda i: (0, 0, 0)),
        ],
        out_specs=pl.BlockSpec((tb, OUT_LANES), lambda i: (i, 0)),
        compiler_params=pltpu.CompilerParams(
            dimension_semantics=("parallel",),       # splits batch across v7x's 2 TCs
            vmem_limit_bytes=4 * 1024 * 1024),
    )(x, packed["w0"], packed["wh"], packed["whead"], packed["b"])

    return out[:bsz, 0:1], out[:bsz, 1:2], out[:bsz, 2:3]


# ----------------------------------------------------------------------------
# Pure-JAX f32 reference (un-fused) for correctness checking
# ----------------------------------------------------------------------------
def _reference_evaluate(observation, skill, action, p):
    x = jnp.concatenate([observation, skill], axis=-1).astype(jnp.float32)
    h = jax.nn.relu(x @ p["wa0"] + p["ba0"])
    for i in range(ACTOR_LAYERS - 1):
        h = jax.nn.relu(h @ p["wah"][i] + p["bah"][i])
    mu = h @ p["wmu"] + p["bmu"]
    sigma = jnp.clip(h @ p["wsg"] + p["bsg"], 1e-6, 1.0)

    hc = jax.nn.relu(x @ p["wc0"] + p["bc0"])
    for i in range(CRITIC_LAYERS - 1):
        hc = jax.nn.relu(hc @ p["wch"][i] + p["bch"][i])
    value = hc @ p["wv"] + p["bv"]

    zz = (action - mu) / sigma
    logp = jnp.sum(-0.5 * zz * zz - jnp.log(sigma) - 0.5 * _LOG_2PI,
                   axis=-1, keepdims=True)
    ent = jnp.sum(0.5 + 0.5 * _LOG_2PI + jnp.log(sigma), axis=-1, keepdims=True)
    return logp, value, ent


if __name__ == "__main__":
    key = jax.random.PRNGKey(0)
    k_obs, k_skill, k_act, k_param = jax.random.split(key, 4)

    observation = jax.random.normal(k_obs, (B, OBS_DIMS), jnp.float32)
    # skills in {-1, 0, 1} like the sampler in the reference file
    skill = jnp.round(jax.random.uniform(k_skill, (B, SKILL_DIMS),
                                         minval=-1.0, maxval=1.0))
    action = jnp.clip(jax.random.normal(k_act, (B, N_ACTIONS), jnp.float32), -1.0, 1.0)

    raw_params = make_params(k_param)
    packed = pack_params(raw_params, batch_tile=BATCH_TILE)   # one-time prep, outside jit

    logp, value, ent = actor_critic_evaluate(observation, skill, action, packed)
    jax.block_until_ready((logp, value, ent))

    assert logp.shape == (B, 1) and value.shape == (B, 1) and ent.shape == (B, 1)
    assert bool(jnp.all(jnp.isfinite(logp))) and bool(jnp.all(jnp.isfinite(value)))
    assert bool(jnp.all(jnp.isfinite(ent)))

    # Numerical check of the fused bf16-matmul kernel against the f32 reference.
    logp_r, value_r, ent_r = _reference_evaluate(observation, skill, action, raw_params)

    def _rel_err(a, b):
        return float(jnp.max(jnp.abs(a - b) / (jnp.abs(b) + 1.0)))

    assert _rel_err(logp, logp_r) < 2e-2, "logp mismatch vs reference"
    assert _rel_err(value, value_r) < 2e-2, "value mismatch vs reference"
    assert _rel_err(ent, ent_r) < 2e-2, "entropy mismatch vs reference"

    print("KERNEL_OK")
</pallas_src>

<mosaic_0001>
module attributes {stable_mosaic.version = 11 : i64} {
  func.func @_actor_critic_kernel(%arg0: i32, %arg1: memref<8x64xf32, #tpu.memory_space<vmem>>, %arg2: memref<64x128xbf16, #tpu.memory_space<vmem>>, %arg3: memref<5x128x128xbf16, #tpu.memory_space<vmem>>, %arg4: memref<128x128xbf16, #tpu.memory_space<vmem>>, %arg5: memref<7x8x128xf32, #tpu.memory_space<vmem>>, %arg6: memref<8x8xf32, #tpu.memory_space<vmem>>) attributes {dimension_semantics = [#tpu.dimension_semantics<parallel>], iteration_bounds = array<i64: 1>, scalar_prefetch = 0 : i64, scratch_operands = 0 : i64, tpu.core_type = #tpu.core_type<tc>, window_params = [{transform_indices = @transform_0, window_bounds = array<i64: 8, 64>}, {pipeline_mode = #tpu.pipeline_mode<synchronous>, transform_indices = @transform_1, window_bounds = array<i64: 64, 128>}, {pipeline_mode = #tpu.pipeline_mode<synchronous>, transform_indices = @transform_2, window_bounds = array<i64: 5, 128, 128>}, {pipeline_mode = #tpu.pipeline_mode<synchronous>, transform_indices = @transform_3, window_bounds = array<i64: 128, 128>}, {pipeline_mode = #tpu.pipeline_mode<synchronous>, transform_indices = @transform_4, window_bounds = array<i64: 7, 8, 128>}, {transform_indices = @transform_5, window_bounds = array<i64: 8, 8>}]} {
    %c0 = arith.constant 0 : index
    %c0_0 = arith.constant 0 : index
    %0 = vector.load %arg1[%c0, %c0_0] : memref<8x64xf32, #tpu.memory_space<vmem>>, vector<8x64xf32>
    %1 = vector.extract_strided_slice %0 {offsets = [0, 32], sizes = [8, 2], strides = [1, 1]} : vector<8x64xf32> to vector<8x2xf32>
    %2 = arith.truncf %0 : vector<8x64xf32> to vector<8x64xbf16>
    %c0_1 = arith.constant 0 : index
    %c0_2 = arith.constant 0 : index
    %3 = vector.load %arg2[%c0_1, %c0_2] : memref<64x128xbf16, #tpu.memory_space<vmem>>, vector<64x128xbf16>
    %cst = arith.constant dense<0.000000e+00> : vector<8x128xf32>
    %4 = tpu.matmul %2, %3, %cst {dimension_numbers = #tpu.dot_dimension_numbers<[1], [0], [0], [1], [0, 0, 1, 1], [], []>} : vector<8x64xbf16>, vector<64x128xbf16>, vector<8x128xf32> -> vector<8x128xf32>
    %c0_3 = arith.constant 0 : index
    %c0_4 = arith.constant 0 : index
    %c0_5 = arith.constant 0 : index
    %5 = vector.load %arg5[%c0_3, %c0_4, %c0_5] : memref<7x8x128xf32, #tpu.memory_space<vmem>>, vector<1x8x128xf32>
    %6 = vector.shape_cast %5 : vector<1x8x128xf32> to vector<8x128xf32>
    %7 = arith.addf %4, %6 : vector<8x128xf32>
    %cst_6 = arith.constant 0.000000e+00 : f32
    %8 = vector.broadcast %cst_6 : f32 to vector<8x128xf32>
    %9 = arith.maximumf %7, %8 : vector<8x128xf32>
    %10 = arith.truncf %9 : vector<8x128xf32> to vector<8x128xbf16>
    %c0_7 = arith.constant 0 : index
    %c0_8 = arith.constant 0 : index
    %c0_9 = arith.constant 0 : index
    %11 = vector.load %arg3[%c0_7, %c0_8, %c0_9] : memref<5x128x128xbf16, #tpu.memory_space<vmem>>, vector<1x128x128xbf16>
    %12 = vector.shape_cast %11 : vector<1x128x128xbf16> to vector<128x128xbf16>
    %cst_10 = arith.constant dense<0.000000e+00> : vector<8x128xf32>
    %13 = tpu.matmul %10, %12, %cst_10 {dimension_numbers = #tpu.dot_dimension_numbers<[1], [0], [0], [1], [0, 0, 1, 1], [], []>} : vector<8x128xbf16>, vector<128x128xbf16>, vector<8x128xf32> -> vector<8x128xf32>
    %c1 = arith.constant 1 : index
    %c0_11 = arith.constant 0 : index
    %c0_12 = arith.constant 0 : index
    %14 = vector.load %arg5[%c1, %c0_11, %c0_12] : memref<7x8x128xf32, #tpu.memory_space<vmem>>, vector<1x8x128xf32>
    %15 = vector.shape_cast %14 : vector<1x8x128xf32> to vector<8x128xf32>
    %16 = arith.addf %13, %15 : vector<8x128xf32>
    %cst_13 = arith.constant 0.000000e+00 : f32
    %17 = vector.broadcast %cst_13 : f32 to vector<8x128xf32>
    %18 = arith.maximumf %16, %17 : vector<8x128xf32>
    %19 = arith.truncf %18 : vector<8x128xf32> to vector<8x128xbf16>
    %c1_14 = arith.constant 1 : index
    %c0_15 = arith.constant 0 : index
    %c0_16 = arith.constant 0 : index
    %20 = vector.load %arg3[%c1_14, %c0_15, %c0_16] : memref<5x128x128xbf16, #tpu.memory_space<vmem>>, vector<1x128x128xbf16>
    %21 = vector.shape_cast %20 : vector<1x128x128xbf16> to vector<128x128xbf16>
    %cst_17 = arith.constant dense<0.000000e+00> : vector<8x128xf32>
    %22 = tpu.matmul %19, %21, %cst_17 {dimension_numbers = #tpu.dot_dimension_numbers<[1], [0], [0], [1], [0, 0, 1, 1], [], []>} : vector<8x128xbf16>, vector<128x128xbf16>, vector<8x128xf32> -> vector<8x128xf32>
    %c2 = arith.constant 2 : index
    %c0_18 = arith.constant 0 : index
    %c0_19 = arith.constant 0 : index
    %23 = vector.load %arg5[%c2, %c0_18, %c0_19] : memref<7x8x128xf32, #tpu.memory_space<vmem>>, vector<1x8x128xf32>
    %24 = vector.shape_cast %23 : vector<1x8x128xf32> to vector<8x128xf32>
    %25 = arith.addf %22, %24 : vector<8x128xf32>
    %cst_20 = arith.constant 0.000000e+00 : f32
    %26 = vector.broadcast %cst_20 : f32 to vector<8x128xf32>
    %27 = arith.maximumf %25, %26 : vector<8x128xf32>
    %28 = arith.truncf %27 : vector<8x128xf32> to vector<8x128xbf16>
    %c2_21 = arith.constant 2 : index
    %c0_22 = arith.constant 0 : index
    %c0_23 = arith.constant 0 : index
    %29 = vector.load %arg3[%c2_21, %c0_22, %c0_23] : memref<5x128x128xbf16, #tpu.memory_space<vmem>>, vector<1x128x128xbf16>
    %30 = vector.shape_cast %29 : vector<1x128x128xbf16> to vector<128x128xbf16>
    %cst_24 = arith.constant dense<0.000000e+00> : vector<8x128xf32>
    %31 = tpu.matmul %28, %30, %cst_24 {dimension_numbers = #tpu.dot_dimension_numbers<[1], [0], [0], [1], [0, 0, 1, 1], [], []>} : vector<8x128xbf16>, vector<128x128xbf16>, vector<8x128xf32> -> vector<8x128xf32>
    %c3 = arith.constant 3 : index
    %c0_25 = arith.constant 0 : index
    %c0_26 = arith.constant 0 : index
    %32 = vector.load %arg5[%c3, %c0_25, %c0_26] : memref<7x8x128xf32, #tpu.memory_space<vmem>>, vector<1x8x128xf32>
    %33 = vector.shape_cast %32 : vector<1x8x128xf32> to vector<8x128xf32>
    %34 = arith.addf %31, %33 : vector<8x128xf32>
    %cst_27 = arith.constant 0.000000e+00 : f32
    %35 = vector.broadcast %cst_27 : f32 to vector<8x128xf32>
    %36 = arith.maximumf %34, %35 : vector<8x128xf32>
    %37 = arith.truncf %36 : vector<8x128xf32> to vector<8x128xbf16>
    %c3_28 = arith.constant 3 : index
    %c0_29 = arith.constant 0 : index
    %c0_30 = arith.constant 0 : index
    %38 = vector.load %arg3[%c3_28, %c0_29, %c0_30] : memref<5x128x128xbf16, #tpu.memory_space<vmem>>, vector<1x128x128xbf16>
    %39 = vector.shape_cast %38 : vector<1x128x128xbf16> to vector<128x128xbf16>
    %cst_31 = arith.constant dense<0.000000e+00> : vector<8x128xf32>
    %40 = tpu.matmul %37, %39, %cst_31 {dimension_numbers = #tpu.dot_dimension_numbers<[1], [0], [0], [1], [0, 0, 1, 1], [], []>} : vector<8x128xbf16>, vector<128x128xbf16>, vector<8x128xf32> -> vector<8x128xf32>
    %c4 = arith.constant 4 : index
    %c0_32 = arith.constant 0 : index
    %c0_33 = arith.constant 0 : index
    %41 = vector.load %arg5[%c4, %c0_32, %c0_33] : memref<7x8x128xf32, #tpu.memory_space<vmem>>, vector<1x8x128xf32>
    %42 = vector.shape_cast %41 : vector<1x8x128xf32> to vector<8x128xf32>
    %43 = arith.addf %40, %42 : vector<8x128xf32>
    %cst_34 = arith.constant 0.000000e+00 : f32
    %44 = vector.broadcast %cst_34 : f32 to vector<8x128xf32>
    %45 = arith.maximumf %43, %44 : vector<8x128xf32>
    %46 = arith.truncf %45 : vector<8x128xf32> to vector<8x128xbf16>
    %c4_35 = arith.constant 4 : index
    %c0_36 = arith.constant 0 : index
    %c0_37 = arith.constant 0 : index
    %47 = vector.load %arg3[%c4_35, %c0_36, %c0_37] : memref<5x128x128xbf16, #tpu.memory_space<vmem>>, vector<1x128x128xbf16>
    %48 = vector.shape_cast %47 : vector<1x128x128xbf16> to vector<128x128xbf16>
    %cst_38 = arith.constant dense<0.000000e+00> : vector<8x128xf32>
    %49 = tpu.matmul %46, %48, %cst_38 {dimension_numbers = #tpu.dot_dimension_numbers<[1], [0], [0], [1], [0, 0, 1, 1], [], []>} : vector<8x128xbf16>, vector<128x128xbf16>, vector<8x128xf32> -> vector<8x128xf32>
    %c5 = arith.constant 5 : index
    %c0_39 = arith.constant 0 : index
    %c0_40 = arith.constant 0 : index
    %50 = vector.load %arg5[%c5, %c0_39, %c0_40] : memref<7x8x128xf32, #tpu.memory_space<vmem>>, vector<1x8x128xf32>
    %51 = vector.shape_cast %50 : vector<1x8x128xf32> to vector<8x128xf32>
    %52 = arith.addf %49, %51 : vector<8x128xf32>
    %cst_41 = arith.constant 0.000000e+00 : f32
    %53 = vector.broadcast %cst_41 : f32 to vector<8x128xf32>
    %54 = arith.maximumf %52, %53 : vector<8x128xf32>
    %55 = arith.truncf %54 : vector<8x128xf32> to vector<8x128xbf16>
    %c0_42 = arith.constant 0 : index
    %c0_43 = arith.constant 0 : index
    %56 = vector.load %arg4[%c0_42, %c0_43] : memref<128x128xbf16, #tpu.memory_space<vmem>>, vector<128x128xbf16>
    %cst_44 = arith.constant dense<0.000000e+00> : vector<8x128xf32>
    %57 = tpu.matmul %55, %56, %cst_44 {dimension_numbers = #tpu.dot_dimension_numbers<[1], [0], [0], [1], [0, 0, 1, 1], [], []>} : vector<8x128xbf16>, vector<128x128xbf16>, vector<8x128xf32> -> vector<8x128xf32>
    %c6 = arith.constant 6 : index
    %c0_45 = arith.constant 0 : index
    %c0_46 = arith.constant 0 : index
    %58 = vector.load %arg5[%c6, %c0_45, %c0_46] : memref<7x8x128xf32, #tpu.memory_space<vmem>>, vector<1x8x128xf32>
    %59 = vector.shape_cast %58 : vector<1x8x128xf32> to vector<8x128xf32>
    %60 = arith.addf %57, %59 : vector<8x128xf32>
    %61 = vector.extract_strided_slice %60 {offsets = [0, 0], sizes = [8, 2], strides = [1, 1]} : vector<8x128xf32> to vector<8x2xf32>
    %62 = vector.extract_strided_slice %60 {offsets = [0, 2], sizes = [8, 2], strides = [1, 1]} : vector<8x128xf32> to vector<8x2xf32>
    %cst_47 = arith.constant 9.99999997E-7 : f32
    %cst_48 = arith.constant 1.000000e+00 : f32
    %63 = vector.broadcast %cst_47 : f32 to vector<8x2xf32>
    %64 = arith.maximumf %63, %62 : vector<8x2xf32>
    %65 = vector.broadcast %cst_48 : f32 to vector<8x2xf32>
    %66 = arith.minimumf %65, %64 : vector<8x2xf32>
    %67 = vector.extract_strided_slice %60 {offsets = [0, 4], sizes = [8, 1], strides = [1, 1]} : vector<8x128xf32> to vector<8x1xf32>
    %68 = arith.subf %1, %61 : vector<8x2xf32>
    %69 = arith.divf %68, %66 : vector<8x2xf32>
    %70 = math.log %66 : vector<8x2xf32>
    %cst_49 = arith.constant -5.000000e-01 : f32
    %71 = vector.broadcast %cst_49 : f32 to vector<8x2xf32>
    %72 = arith.mulf %71, %69 : vector<8x2xf32>
    %73 = arith.mulf %72, %69 : vector<8x2xf32>
    %74 = arith.subf %73, %70 : vector<8x2xf32>
    %cst_50 = arith.constant 0.918938517 : f32
    %75 = vector.broadcast %cst_50 : f32 to vector<8x2xf32>
    %76 = arith.subf %74, %75 : vector<8x2xf32>
    %cst_51 = arith.constant 1.41893852 : f32
    %77 = vector.broadcast %cst_51 : f32 to vector<8x2xf32>
    %78 = arith.addf %77, %70 : vector<8x2xf32>
    %79 = vector.extract_strided_slice %76 {offsets = [0, 0], sizes = [8, 1], strides = [1, 1]} : vector<8x2xf32> to vector<8x1xf32>
    %80 = vector.extract_strided_slice %76 {offsets = [0, 1], sizes = [8, 1], strides = [1, 1]} : vector<8x2xf32> to vector<8x1xf32>
    %81 = arith.addf %79, %80 : vector<8x1xf32>
    %82 = vector.extract_strided_slice %78 {offsets = [0, 0], sizes = [8, 1], strides = [1, 1]} : vector<8x2xf32> to vector<8x1xf32>
    %83 = vector.extract_strided_slice %78 {offsets = [0, 1], sizes = [8, 1], strides = [1, 1]} : vector<8x2xf32> to vector<8x1xf32>
    %84 = arith.addf %82, %83 : vector<8x1xf32>
    %c0_52 = arith.constant 0 : index
    %c0_53 = arith.constant 0 : index
    %85 = vector.load %arg6[%c0_52, %c0_53] : memref<8x8xf32, #tpu.memory_space<vmem>>, vector<8x1xf32>
    tpu.vector_store %arg6[%c0_52, %c0_53], %81 {strides = array<i32>} : memref<8x8xf32, #tpu.memory_space<vmem>>, vector<8x1xf32>,
    %c0_54 = arith.constant 0 : index
    %c1_55 = arith.constant 1 : index
    %86 = vector.load %arg6[%c0_54, %c1_55] : memref<8x8xf32, #tpu.memory_space<vmem>>, vector<8x1xf32>
    tpu.vector_store %arg6[%c0_54, %c1_55], %67 {strides = array<i32>} : memref<8x8xf32, #tpu.memory_space<vmem>>, vector<8x1xf32>,
    %c0_56 = arith.constant 0 : index
    %c2_57 = arith.constant 2 : index
    %87 = vector.load %arg6[%c0_56, %c2_57] : memref<8x8xf32, #tpu.memory_space<vmem>>, vector<8x1xf32>
    tpu.vector_store %arg6[%c0_56, %c2_57], %84 {strides = array<i32>} : memref<8x8xf32, #tpu.memory_space<vmem>>, vector<8x1xf32>,
    %cst_58 = arith.constant 0.000000e+00 : f32
    %88 = vector.broadcast %cst_58 : f32 to vector<8x5xf32>
    %c0_59 = arith.constant 0 : index
    %c3_60 = arith.constant 3 : index
    %89 = vector.load %arg6[%c0_59, %c3_60] : memref<8x8xf32, #tpu.memory_space<vmem>>, vector<8x5xf32>
    tpu.vector_store %arg6[%c0_59, %c3_60], %88 {strides = array<i32>} : memref<8x8xf32, #tpu.memory_space<vmem>>, vector<8x5xf32>,
    return
  }
  func.func @transform_0(%arg0: i32) -> (i32, i32) {
    %c0_i32 = arith.constant 0 : i32
    %c0_i32_0 = arith.constant 0 : i32
    return %arg0, %c0_i32 : i32, i32
  }
  func.func @transform_1(%arg0: i32) -> (i32, i32) {
    %c0_i32 = arith.constant 0 : i32
    %c0_i32_0 = arith.constant 0 : i32
    %c0_i32_1 = arith.constant 0 : i32
    return %c0_i32, %c0_i32_0 : i32, i32
  }
  func.func @transform_2(%arg0: i32) -> (i32, i32, i32) {
    %c0_i32 = arith.constant 0 : i32
    %c0_i32_0 = arith.constant 0 : i32
    %c0_i32_1 = arith.constant 0 : i32
    %c0_i32_2 = arith.constant 0 : i32
    return %c0_i32, %c0_i32_0, %c0_i32_1 : i32, i32, i32
  }
  func.func @transform_3(%arg0: i32) -> (i32, i32) {
    %c0_i32 = arith.constant 0 : i32
    %c0_i32_0 = arith.constant 0 : i32
    %c0_i32_1 = arith.constant 0 : i32
    return %c0_i32, %c0_i32_0 : i32, i32
  }
  func.func @transform_4(%arg0: i32) -> (i32, i32, i32) {
    %c0_i32 = arith.constant 0 : i32
    %c0_i32_0 = arith.constant 0 : i32
    %c0_i32_1 = arith.constant 0 : i32
    %c0_i32_2 = arith.constant 0 : i32
    return %c0_i32, %c0_i32_0, %c0_i32_1 : i32, i32, i32
  }
  func.func @transform_5(%arg0: i32) -> (i32, i32) {
    %c0_i32 = arith.constant 0 : i32
    %c0_i32_0 = arith.constant 0 : i32
    return %arg0, %c0_i32 : i32, i32
  }
}

</mosaic_0001>

<bundles_post_ra>
// kernel: actor_critic_evaluate.1
= control target key start
LH: loop header
LB: loop body
LE: loop exit
PB: predicated region body
PF: predicated region fallthrough
CT: control target
= control target key end

     0   :  { %10 = vsyncpa [#allocation3], 0  ;;  %s1161_s18 = smov [#allocation2]   ;;  %s1357_s0 = inlined_call_operand.vmem [shape: f32[8,64], index: 0, kind: input, shape index: {}]   ;;  %s1358_s1 = inlined_call_operand.vmem [shape: bf16[64,128], index: 1, kind: input, shape index: {}]   ;;  %s1359_s2 = inlined_call_operand.hbm [shape: bf16[5,128,128], index: 2, kind: input, shape index: {}]   ;;  %s1360_s3 = inlined_call_operand.vmem [shape: bf16[128,128], index: 3, kind: input, shape index: {}]   ;;  %s1361_s4 = inlined_call_operand.vmem [shape: f32[7,8,128], index: 4, kind: input, shape index: {}]   ;;  %s1362_s5 = inlined_call_operand.vmem [shape: f32[8,8], index: 5, kind: output, shape index: {}]  }
   0x1   :  { %s20_s19 = sshll.u32 %s1161_s18, 4  ;;  %s1137_s22 = scalar_lea.hbm %s1359_s2, 5120  ;;  %s21_s19 = int_to_ptr.vmem [resolvable:$true] %s20_s19 }
   0x2   :  { %p1138_p0 = scmp.ne.s32.totalorder %s1359_s2, %s1137_s22  ;;  %p1141_p1 = scmp.lt.u32.totalorder %s1137_s22, %s1359_s2 }
   0x4   :  { %p1143_p2 = pnand %p1141_p1, %p1138_p0 }
   0x6   :  { %1146 = shalt.err (!%p1143_p2)
}
   0x7   :  { %s1147_s27 = scalar_lea.vmem %s21_s19, 5120  ;;  %p1152_p4 = scmp.lt.s32.totalorder %s21_s19, %s21_s19 }
   0x8   :  { %p1148_p3 = scmp.ne.s32.totalorder %s21_s19, %s1147_s27  ;;  %p1153_p5 = scmp.lt.s32.totalorder %s1147_s27, %s1147_s27 }
   0xa   :  { %p1154_p6 = por %p1153_p5, %p1152_p4 }
   0xc   :  { %p1155_p7 = pnand %p1154_p6, %p1148_p3 }
   0xe   :  { %1158 = shalt.err (!%p1155_p7)
}
   0xf   :  { %s1162_s28 = smov 64   ;;  %s1163_s29 = smov 4  }
  0x10   :  { %26 = dma.hbm_to_vmem [thread:$0]  %s1359_s2, 5120, %s21_s19, [#allocation3], %s1162_s28, %s1162_s28, %s1163_s29  }
  0x11   :  { %1159 = dma.done.wait [#allocation3], 5120  }
  0x12   :  { %1160 = vsyncadd [#allocation3], 4294962176  ;;  %v1164_v0 = vmov 0.0   ;;  %vm1165_vm0 = vmmov 0   ;;  %v1081_v1 = vld [vmem:[%s1358_s1] sm:$0xff]   ;;  %v1082_v2 = vld [vmem:[%s1358_s1 + $0x8] sm:$0xff]  }
  0x13   :  { %939 = vmatprep.subr.bf16.mxu0 %v1164_v0  ;;  %947 = vmatprep.mubr.msk.bf16.mxu0 %vm1165_vm0, %v1164_v0  ;;  %v1085_v3 = vld [vmem:[#allocation2] sm:$0xff]   ;;  %v1083_v4 = vld [vmem:[%s1358_s1 + $0x10] sm:$0xff]   ;;  %v1086_v5 = vld [vmem:[#allocation2 + $0x8] sm:$0xff]   ;;  %vm70_vm1 = vcmask 523264   ;;  %s1167_s16 = smov 32   ;;  %s1168_s17 = smov 127  }
  0x14   :  { %951 = vmatprep.subr.bf16.mxu1 %v1164_v0  ;;  %967 = vmatprep.mubr.msk.bf16.mxu1 %vm1165_vm0, %v1164_v0  ;;  %v1084_v6 = vld [vmem:[%s1358_s1 + $0x18] sm:$0xff]   ;;  %v1237_v7 = vld [vmem:[%s1357_s0] sm:$0xff]  ;;  %v1087_v8 = vld [vmem:[#allocation2 + $0x10] sm:$0xff]   ;;  %s1169_s18 = smov 125   ;;  %vm804_vm2 = vcmask 7168   ;;  %vm809_vm3 = vcmask 15368  }
  0x15   :  { %940 = vmatpush3.bf16.msra.mxu0 %v1081_v1  ;;  %952 = vmatpush3.bf16.msra.mxu1 %v1085_v3  ;;  %v36_v9 = vpack.c.bf16 %v1237_v7, %v1237_v7  ;;  %v1088_v10 = vld [vmem:[#allocation2 + $0x18] sm:$0xff]   ;;  %v1089_v11 = vld [vmem:[#allocation2 + $0x20] sm:$0xff]   ;;  %v1090_v12 = vld [vmem:[#allocation2 + $0x28] sm:$0xff]   ;;  %vm811_vm4 = vcmask 23568   ;;  %vm813_vm5 = vcmask 64536  }
  0x16   :  { %941 = vmatprep.subr.bf16.mxu0 %v1164_v0  ;;  %953 = vmatprep.subr.bf16.mxu1 %v1164_v0  ;;  %v1091_v13 = vld [vmem:[#allocation2 + $0x30] sm:$0xff]   ;;  %v1092_v14 = vld [vmem:[#allocation2 + $0x38] sm:$0xff]   ;;  %v1093_v15 = vld [vmem:[#allocation2 + $0x40] sm:$0xff]  }
  0x17   :  { %v1094_v16 = vld [vmem:[#allocation2 + $0x48] sm:$0xff]   ;;  %v1095_v17 = vld [vmem:[#allocation2 + $0x50] sm:$0xff]   ;;  %v1096_v18 = vld [vmem:[#allocation2 + $0x58] sm:$0xff]  }
  0x18   :  { %v1097_v19 = vld [vmem:[#allocation2 + $0x60] sm:$0xff]   ;;  %v1098_v20 = vld [vmem:[#allocation2 + $0x68] sm:$0xff]   ;;  %v1099_v29 = vld [vmem:[#allocation2 + $0x70] sm:$0xff]  }
  0x19   :  { %942 = vmatpush3.bf16.msra.mxu0 %v1082_v2  ;;  %954 = vmatpush3.bf16.msra.mxu1 %v1086_v5  ;;  %v45_v21 = vld [vmem:[%s1361_s4] sm:$0xff]  ;;  %v1100_v30 = vld [vmem:[#allocation2 + $0x78] sm:$0xff]   ;;  %v1102_v32 = vld [vmem:[#allocation2 + $0x88] sm:$0xff]  }
  0x1a   :  { %943 = vmatprep.subr.bf16.mxu0 %v1164_v0  ;;  %955 = vmatprep.subr.bf16.mxu1 %v1164_v0  ;;  %v1101_v31 = vld [vmem:[#allocation2 + $0x80] sm:$0xff]   ;;  %v1103_v33 = vld [vmem:[#allocation2 + $0x90] sm:$0xff]   ;;  %v1104_v34 = vld [vmem:[#allocation2 + $0x98] sm:$0xff]  }
  0x1b   :  { %v1105_v35 = vld [vmem:[#allocation2 + $0xa0] sm:$0xff]   ;;  %v1106_v36 = vld [vmem:[#allocation2 + $0xa8] sm:$0xff]   ;;  %v1107_v45 = vld [vmem:[#allocation2 + $0xb0] sm:$0xff]  }
  0x1c   :  { %v825_v37 = vld [vmem:[%s1361_s4 + $0x8] sm:$0xff]  ;;  %v1108_v46 = vld [vmem:[#allocation2 + $0xb8] sm:$0xff]   ;;  %v1109_v47 = vld [vmem:[#allocation2 + $0xc0] sm:$0xff]  }
  0x1d   :  { %944 = vmatpush3.bf16.msra.mxu0 %v1083_v4  ;;  %956 = vmatpush3.bf16.msra.mxu1 %v1087_v8  ;;  %v1110_v48 = vld [vmem:[#allocation2 + $0xc8] sm:$0xff]   ;;  %v1111_v49 = vld [vmem:[#allocation2 + $0xd0] sm:$0xff]   ;;  %v1112_v50 = vld [vmem:[#allocation2 + $0xd8] sm:$0xff]  }
  0x1e   :  { %945 = vmatprep.subr.bf16.mxu0 %v1164_v0  ;;  %957 = vmatprep.subr.bf16.mxu1 %v1164_v0  ;;  %v1113_v51 = vld [vmem:[#allocation2 + $0xe0] sm:$0xff]   ;;  %v1114_v52 = vld [vmem:[#allocation2 + $0xe8] sm:$0xff]   ;;  %v834_v53 = vld [vmem:[%s1361_s4 + $0x10] sm:$0xff] }
  0x1f   :  { %v1115_v61 = vld [vmem:[#allocation2 + $0xf0] sm:$0xff]   ;;  %v1116_v62 = vld [vmem:[#allocation2 + $0xf8] sm:$0xff]   ;;  %v1117_v63 = vld [vmem:[#allocation2 + $0x100] sm:$0xff]  }
  0x20   :  { %v1118_v1 = vld [vmem:[#allocation2 + $0x108] sm:$0xff]   ;;  %v1119_v2 = vld [vmem:[#allocation2 + $0x110] sm:$0xff]   ;;  %v1120_v3 = vld [vmem:[#allocation2 + $0x118] sm:$0xff]  }
  0x21   :  { %946 = vmatpush3.bf16.msra.mxu0 %v1084_v6  ;;  %958 = vmatpush3.bf16.msra.mxu1 %v1088_v10  ;;  %v1121_v4 = vld [vmem:[#allocation2 + $0x120] sm:$0xff]   ;;  %v1122_v5 = vld [vmem:[#allocation2 + $0x128] sm:$0xff]   ;;  %v843_v6 = vld [vmem:[%s1361_s4 + $0x18] sm:$0xff] }
  0x22   :  { %971 = vmatprep.subr.bf16.mxu0 %v1164_v0  ;;  %959 = vmatprep.subr.bf16.mxu1 %v1164_v0 }
  0x24   :  { %948 = vmatmul.mubr.msk.bf16.vlgmr.msra.gmra.mrb[0].mxu0 %vm70_vm1, %v36_v9 }
  0x25   :  { %987 = vmatprep.mubr.msk.bf16.mxu0 %vm1165_vm0, %v1164_v0  ;;  %960 = vmatpush3.bf16.msra.mxu1 %v1089_v11 }
  0x26   :  { %961 = vmatprep.subr.bf16.mxu1 %v1164_v0  ;;  %972 = vmatpush3.bf16.msra.mxu0 %v1093_v15  ;;  %v1123_v15 = vld [vmem:[#allocation2 + $0x130] sm:$0xff]  }
  0x27   :  { %973 = vmatprep.subr.bf16.mxu0 %v1164_v0 }
  0x29   :  { %962 = vmatpush3.bf16.msra.mxu1 %v1090_v12 }
  0x2a   :  { %963 = vmatprep.subr.bf16.mxu1 %v1164_v0  ;;  %974 = vmatpush3.bf16.msra.mxu0 %v1094_v16  ;;  %v1124_v16 = vld [vmem:[#allocation2 + $0x138] sm:$0xff]  }
  0x2b   :  { %975 = vmatprep.subr.bf16.mxu0 %v1164_v0 }
  0x2d   :  { %964 = vmatpush3.bf16.msra.mxu1 %v1091_v13 }
  0x2e   :  { %965 = vmatprep.subr.bf16.mxu1 %v1164_v0  ;;  %976 = vmatpush3.bf16.msra.mxu0 %v1095_v17  ;;  %v1125_v17 = vld [vmem:[%s1360_s3] sm:$0xff]  }
  0x2f   :  { %977 = vmatprep.subr.bf16.mxu0 %v1164_v0 }
  0x31   :  { %966 = vmatpush3.bf16.msra.mxu1 %v1092_v14 }
  0x32   :  { %991 = vmatprep.subr.bf16.mxu1 %v1164_v0  ;;  %978 = vmatpush3.bf16.msra.mxu0 %v1096_v18  ;;  %v1126_v18 = vld [vmem:[%s1360_s3 + $0x8] sm:$0xff]  }
  0x33   :  { %979 = vmatprep.subr.bf16.mxu0 %v1164_v0 }
  0x36   :  { %980 = vmatpush3.bf16.msra.mxu0 %v1097_v19  ;;  %v1127_v19 = vld [vmem:[%s1360_s3 + $0x10] sm:$0xff]  }
  0x37   :  { %981 = vmatprep.subr.bf16.mxu0 %v1164_v0 }
  0x3a   :  { %982 = vmatpush3.bf16.msra.mxu0 %v1098_v20  ;;  %v1128_v20 = vld [vmem:[%s1360_s3 + $0x18] sm:$0xff]  }
  0x3b   :  { %983 = vmatprep.subr.bf16.mxu0 %v1164_v0 }
  0x3e   :  { %984 = vmatpush3.bf16.msra.mxu0 %v1099_v29 }
  0x3f   :  { %985 = vmatprep.subr.bf16.mxu0 %v1164_v0 }
  0x42   :  { %986 = vmatpush3.bf16.msra.mxu0 %v1100_v30 }
  0x43   :  { %1011 = vmatprep.subr.bf16.mxu0 %v1164_v0 }
  0xf7   :  { %v108_v22 = vpop.f32.mrb[0].mxu0 }
  0xf8   :  { %v109_v23 = vadd.f32 %v108_v22, %v45_v21  ;;  %v949_v24 = vpop.f32.mrb[1].mxu0  ;;  %v1129_v21 = vld [vmem:[%s1360_s3 + $0x20] sm:$0xff]   ;;  %v1130_v22 = vld [vmem:[%s1360_s3 + $0x28] sm:$0xff]  }
  0xf9   :  { %v111_v25 = vpop.f32.mrb[2].mxu0 }
  0xfa   :  { %v114_v26 = vmax.f32 %v109_v23, 0.0  ;;  %v950_v27 = vpop.f32.mrb[3].mxu0  ;;  %v852_v23 = vld [vmem:[%s1361_s4 + $0x20] sm:$0xff] }
  0xfc   :  { %v115_v28 = vpack.c.bf16 %v114_v26, %v114_v26 }
  0xfe   :  { %968 = vmatmul.mubr.bf16.vlgmr.msra.gmra.mrb[0].mxu1 %v115_v28 }
  0xff   :  { %1007 = vmatprep.mubr.msk.bf16.mxu1 %vm1165_vm0, %v1164_v0  ;;  %992 = vmatpush3.bf16.msra.mxu1 %v1101_v31  ;;  %v1131_v31 = vld [vmem:[%s1360_s3 + $0x30] sm:$0xff]  }
 0x100   :  { %993 = vmatprep.subr.bf16.mxu1 %v1164_v0 }
 0x103   :  { %994 = vmatpush3.bf16.msra.mxu1 %v1102_v32  ;;  %v1132_v32 = vld [vmem:[%s1360_s3 + $0x38] sm:$0xff]   ;;  %s1166_s3 = smov 30  }
 0x104   :  { %995 = vmatprep.subr.bf16.mxu1 %v1164_v0 }
 0x107   :  { %996 = vmatpush3.bf16.msra.mxu1 %v1103_v33  ;;  %v861_v33 = vld [vmem:[%s1361_s4 + $0x28] sm:$0xff] }
 0x108   :  { %997 = vmatprep.subr.bf16.mxu1 %v1164_v0 }
 0x10b   :  { %998 = vmatpush3.bf16.msra.mxu1 %v1104_v34 }
 0x10c   :  { %999 = vmatprep.subr.bf16.mxu1 %v1164_v0 }
 0x10f   :  { %1000 = vmatpush3.bf16.msra.mxu1 %v1105_v35 }
 0x110   :  { %1001 = vmatprep.subr.bf16.mxu1 %v1164_v0 }
 0x113   :  { %1002 = vmatpush3.bf16.msra.mxu1 %v1106_v36 }
 0x114   :  { %1003 = vmatprep.subr.bf16.mxu1 %v1164_v0 }
 0x117   :  { %1004 = vmatpush3.bf16.msra.mxu1 %v1107_v45 }
 0x118   :  { %1005 = vmatprep.subr.bf16.mxu1 %v1164_v0 }
 0x11b   :  { %1006 = vmatpush3.bf16.msra.mxu1 %v1108_v46 }
 0x11c   :  { %1031 = vmatprep.subr.bf16.mxu1 %v1164_v0 }
 0x1d1   :  { %v216_v38 = vpop.f32.mrb[0].mxu1 }
 0x1d2   :  { %v217_v39 = vadd.f32 %v825_v37, %v216_v38  ;;  %v969_v40 = vpop.f32.mrb[1].mxu1 }
 0x1d3   :  { %v219_v41 = vpop.f32.mrb[2].mxu1 }
 0x1d4   :  { %v222_v42 = vmax.f32 %v217_v39, 0.0  ;;  %v970_v43 = vpop.f32.mrb[3].mxu1  ;;  %v870_v41 = vld [vmem:[%s1361_s4 + $0x30] sm:$0xff]  ;;  %s1170_s4 = smov 96  }
 0x1d6   :  { %v223_v44 = vpack.c.bf16 %v222_v42, %v222_v42 }
 0x1d8   :  { %988 = vmatmul.mubr.bf16.vlgmr.msra.gmra.mrb[4].mxu0 %v223_v44 }
 0x1d9   :  { %1027 = vmatprep.mubr.msk.bf16.mxu0 %vm1165_vm0, %v1164_v0  ;;  %1012 = vmatpush3.bf16.msra.mxu0 %v1109_v47 }
 0x1da   :  { %1013 = vmatprep.subr.bf16.mxu0 %v1164_v0 }
 0x1dd   :  { %1014 = vmatpush3.bf16.msra.mxu0 %v1110_v48 }
 0x1de   :  { %1015 = vmatprep.subr.bf16.mxu0 %v1164_v0 }
 0x1e1   :  { %1016 = vmatpush3.bf16.msra.mxu0 %v1111_v49 }
 0x1e2   :  { %1017 = vmatprep.subr.bf16.mxu0 %v1164_v0 }
 0x1e5   :  { %1018 = vmatpush3.bf16.msra.mxu0 %v1112_v50 }
 0x1e6   :  { %1019 = vmatprep.subr.bf16.mxu0 %v1164_v0 }
 0x1e9   :  { %1020 = vmatpush3.bf16.msra.mxu0 %v1113_v51 }
 0x1ea   :  { %1021 = vmatprep.subr.bf16.mxu0 %v1164_v0 }
 0x1ed   :  { %1022 = vmatpush3.bf16.msra.mxu0 %v1114_v52 }
 0x1ee   :  { %1023 = vmatprep.subr.bf16.mxu0 %v1164_v0 }
 0x1f1   :  { %1024 = vmatpush3.bf16.msra.mxu0 %v1115_v61 }
 0x1f2   :  { %1025 = vmatprep.subr.bf16.mxu0 %v1164_v0 }
 0x1f5   :  { %1026 = vmatpush3.bf16.msra.mxu0 %v1116_v62 }
 0x1f6   :  { %1051 = vmatprep.subr.bf16.mxu0 %v1164_v0 }
 0x2ab   :  { %v325_v54 = vpop.f32.mrb[4].mxu0 }
 0x2ac   :  { %v326_v55 = vadd.f32 %v834_v53, %v325_v54  ;;  %v989_v56 = vpop.f32.mrb[5].mxu0 }
 0x2ad   :  { %v328_v57 = vpop.f32.mrb[6].mxu0 }
 0x2ae   :  { %v331_v58 = vmax.f32 %v326_v55, 0.0  ;;  %v990_v59 = vpop.f32.mrb[7].mxu0 }
 0x2b0   :  { %v332_v60 = vpack.c.bf16 %v331_v58, %v331_v58 }
 0x2b2   :  { %1008 = vmatmul.mubr.bf16.vlgmr.msra.gmra.mrb[4].mxu1 %v332_v60 }
 0x2b3   :  { %1047 = vmatprep.mubr.msk.bf16.mxu1 %vm1165_vm0, %v1164_v0  ;;  %1032 = vmatpush3.bf16.msra.mxu1 %v1117_v63 }
 0x2b4   :  { %1033 = vmatprep.subr.bf16.mxu1 %v1164_v0 }
 0x2b7   :  { %1034 = vmatpush3.bf16.msra.mxu1 %v1118_v1 }
 0x2b8   :  { %1035 = vmatprep.subr.bf16.mxu1 %v1164_v0 }
 0x2bb   :  { %1036 = vmatpush3.bf16.msra.mxu1 %v1119_v2 }
 0x2bc   :  { %1037 = vmatprep.subr.bf16.mxu1 %v1164_v0 }
 0x2bf   :  { %1038 = vmatpush3.bf16.msra.mxu1 %v1120_v3 }
 0x2c0   :  { %1039 = vmatprep.subr.bf16.mxu1 %v1164_v0 }
 0x2c3   :  { %1040 = vmatpush3.bf16.msra.mxu1 %v1121_v4 }
 0x2c4   :  { %1041 = vmatprep.subr.bf16.mxu1 %v1164_v0 }
 0x2c7   :  { %1042 = vmatpush3.bf16.msra.mxu1 %v1122_v5 }
 0x2c8   :  { %1043 = vmatprep.subr.bf16.mxu1 %v1164_v0 }
 0x2cb   :  { %1044 = vmatpush3.bf16.msra.mxu1 %v1123_v15 }
 0x2cc   :  { %1045 = vmatprep.subr.bf16.mxu1 %v1164_v0 }
 0x2cf   :  { %1046 = vmatpush3.bf16.msra.mxu1 %v1124_v16 }
 0x385   :  { %v434_v8 = vpop.f32.mrb[4].mxu1 }
 0x386   :  { %v435_v9 = vadd.f32 %v843_v6, %v434_v8  ;;  %v1009_v10 = vpop.f32.mrb[5].mxu1 }
 0x387   :  { %v437_v11 = vpop.f32.mrb[6].mxu1 }
 0x388   :  { %v440_v12 = vmax.f32 %v435_v9, 0.0  ;;  %v1010_v13 = vpop.f32.mrb[7].mxu1 }
 0x38a   :  { %v441_v14 = vpack.c.bf16 %v440_v12, %v440_v12 }
 0x38c   :  { %1028 = vmatmul.mubr.bf16.vlgmr.msra.gmra.mrb[8].mxu0 %v441_v14 }
 0x38d   :  { %1067 = vmatprep.mubr.msk.bf16.mxu0 %vm1165_vm0, %v1164_v0  ;;  %1052 = vmatpush3.bf16.msra.mxu0 %v1125_v17 }
 0x38e   :  { %1053 = vmatprep.subr.bf16.mxu0 %v1164_v0 }
 0x391   :  { %1054 = vmatpush3.bf16.msra.mxu0 %v1126_v18 }
 0x392   :  { %1055 = vmatprep.subr.bf16.mxu0 %v1164_v0 }
 0x395   :  { %1056 = vmatpush3.bf16.msra.mxu0 %v1127_v19 }
 0x396   :  { %1057 = vmatprep.subr.bf16.mxu0 %v1164_v0 }
 0x399   :  { %1058 = vmatpush3.bf16.msra.mxu0 %v1128_v20 }
 0x39a   :  { %1059 = vmatprep.subr.bf16.mxu0 %v1164_v0 }
 0x39d   :  { %1060 = vmatpush3.bf16.msra.mxu0 %v1129_v21 }
 0x39e   :  { %1061 = vmatprep.subr.bf16.mxu0 %v1164_v0 }
 0x3a1   :  { %1062 = vmatpush3.bf16.msra.mxu0 %v1130_v22 }
 0x3a2   :  { %1063 = vmatprep.subr.bf16.mxu0 %v1164_v0 }
 0x3a5   :  { %1064 = vmatpush3.bf16.msra.mxu0 %v1131_v31 }
 0x3a6   :  { %1065 = vmatprep.subr.bf16.mxu0 %v1164_v0 }
 0x3a9   :  { %1066 = vmatpush3.bf16.msra.mxu0 %v1132_v32 }
 0x45f   :  { %v543_v24 = vpop.f32.mrb[8].mxu0 }
 0x460   :  { %v544_v25 = vadd.f32 %v852_v23, %v543_v24  ;;  %v1029_v26 = vpop.f32.mrb[9].mxu0 }
 0x461   :  { %v546_v27 = vpop.f32.mrb[10].mxu0 }
 0x462   :  { %v549_v28 = vmax.f32 %v544_v25, 0.0  ;;  %v1030_v29 = vpop.f32.mrb[11].mxu0 }
 0x464   :  { %v550_v30 = vpack.c.bf16 %v549_v28, %v549_v28 }
 0x466   :  { %1048 = vmatmul.mubr.bf16.vlgmr.msra.gmra.mrb[8].mxu1 %v550_v30 }
 0x539   :  { %v652_v34 = vpop.f32.mrb[8].mxu1 }
 0x53a   :  { %v653_v35 = vadd.f32 %v861_v33, %v652_v34  ;;  %v1049_v36 = vpop.f32.mrb[9].mxu1 }
 0x53b   :  { %v655_v37 = vpop.f32.mrb[10].mxu1 }
 0x53c   :  { %v658_v38 = vmax.f32 %v653_v35, 0.0  ;;  %v1050_v39 = vpop.f32.mrb[11].mxu1 }
 0x53e   :  { %v659_v40 = vpack.c.bf16 %v658_v38, %v658_v38 }
 0x540   :  { %1068 = vmatmul.mubr.bf16.vlgmr.msra.gmra.mrb[12].mxu0 %v659_v40 }
 0x613   :  { %v760_v42 = vpop.f32.mrb[12].mxu0 }
 0x614   :  { %v761_v43 = vadd.f32 %v870_v41, %v760_v42  ;;  %v1069_v44 = vpop.f32.mrb[13].mxu0 }
 0x615   :  { %v763_v45 = vpop.f32.mrb[14].mxu0 }
 0x616   :  { %v1070_v46 = vpop.f32.mrb[15].mxu0  ;;  %v766_v47 = vmax.f32 %v761_v43, 1e-06 }
 0x618   :  { %v767_v48 = vmin.f32 %v766_v47, 1.0 }
 0x61a   :  { %774 = vrot.lane.b32.xlu0 %v767_v48, %s1166_s3  ;;  %1133 = vlog2.f32 %v767_v48 }
 0x61e   :  { %769 = vrot.lane.b32.xlu0 %v761_v43, %s1167_s16 }
 0x624   :  { %v1134_v49 = vpop.eup %1133 }
 0x625   :  { %v780_v50 = vmul.f32 0.6931472, %v1134_v49 }
 0x627   :  { %784 = vrot.lane.b32.xlu1 %v780_v50, %s1166_s3  ;;  %v789_v51 = vadd.f32 1.4189385, %v780_v50 }
 0x629   :  { %796 = vrot.lane.b32.xlu0 %v789_v51, %s1168_s17 }
 0x62d   :  { %806 = vrot.lane.b32.xlu0 %v761_v43, %s1169_s18 }
 0x68c   :  { %v775_v52 = vpop.permute.xlu0 %774 }
 0x68d   :  { %1135 = vrcp.f32 %v775_v52 }
 0x690   :  { %v770_v53 = vpop.permute.xlu0 %769 }
 0x691   :  { %v772_v54 = vsub.f32 %v1237_v7, %v770_v53 }
 0x697   :  { %v1136_v55 = vpop.eup %1135 }
 0x698   :  { %v778_v56 = vmul.f32 %v1136_v55, %v772_v54 }
 0x699   :  { %v785_v59 = vpop.permute.xlu1 %784 }
 0x69a   :  { %v781_v57 = vmul.f32 -0.5, %v778_v56 }
 0x69b   :  { %v797_v1 = vpop.permute.xlu0 %796 }
 0x69c   :  { %v782_v58 = vmul.f32 %v781_v57, %v778_v56  ;;  %v799_v3 = vadd.f32 %v797_v1, %v789_v51 }
 0x69e   :  { %v787_v60 = vsub.f32 %v782_v58, %v785_v59 }
 0x69f   :  { %v807_v4 = vpop.permute.xlu0 %806 }
 0x6a0   :  { %v879_v61 = vadd.f32 -0.9189385, %v787_v60 }
 0x6a2   :  { %791 = vrot.lane.b32.xlu1 %v879_v61, %s1168_s17 }
 0x714   :  { %v792_v62 = vpop.permute.xlu1 %791 }
 0x715   :  { %v794_v63 = vadd.f32 %v879_v61, %v792_v62 }
 0x717   :  { %801 = vrot.lane.b32.xlu1 %v794_v63, %s1170_s4 }
 0x789   :  { %v802_v2 = vpop.permute.xlu1 %801 }
 0x78a   :  { %805 = vst.msk [vmem:[%s1362_s5] sm:$0xff] %vm804_vm2, %v802_v2 }
 0x78b   :  { %810 = vst.msk [vmem:[%s1362_s5] sm:$0xff] %vm809_vm3, %v807_v4 }
 0x78c   :  { %812 = vst.msk [vmem:[%s1362_s5] sm:$0xff] %vm811_vm4, %v799_v3 }
 0x78d   :  { %814 = vst.msk [vmem:[%s1362_s5] sm:$0xff] %vm813_vm5, %v1164_v0 }
 0x78e   :  { %819 = vsyncpa [#allocation3], 1 }

</bundles_post_ra>
